<compile_context>
chip_gen: v7x
topology: tpu7x:2x2x1
jax: 0.10.0
libtpu: 0.0.40
codegen_flags: <defaults>
</compile_context>

<pallas_src>
import jax
import jax.numpy as jnp
from jax.experimental import pallas as pl
from jax.experimental.pallas import tpu as pltpu
import numpy as np

C = 4            # dim_of_state[0] == dim_of_actions
XCOLS = 128      # packed input width: 80 state | 4 action | 44 zero (lane dense)
A_OFF = C * 20   # column where the action starts inside the packed input (80)
NA = 384         # layer-1 width: 320 conv1 | 12 conv2 | 52 zero  (= 3*128)
H1_ACT = 320     # column where conv2 (action) outputs start inside h1

# Slab-B row offsets (all multiples of 16 -> bf16 sublane aligned).
N_MID = 33       # 32 hid2 outputs + 1 folded action/bias tail column
R_W4 = 384       # hid4 weights (32, 64)
R_W69 = 416      # folded hid6 @ hid9_state (64, 1)
WB_ROWS = 480
WB_COLS = 64


# ----------------------------- Pallas kernel --------------------------------
def portfolio_kernel(x_ref, wa_ref, wb_ref, b_ref, q_ref):
    """x_ref : (TB, 128) bf16  packed [state(80) | action(4) | 0(44)]
       wa_ref: (128, 384) bf16 fused conv1 + conv2(1x1) layer
       wb_ref: (480, 64)  bf16 packed tail weights
       b_ref : (8, 384)   f32  packed biases
       q_ref : (TB, 1)    f32  Q values"""
    f32 = jnp.float32
    bf16 = jnp.bfloat16

    # layer 1: conv1 (folded to one matmul) + conv2 (1x1) in a single MXU push
    h1 = jnp.maximum(
        jnp.dot(x_ref[...], wa_ref[...], preferred_element_type=f32)
        + b_ref[0:1, :], 0.0)                                      # (TB, 384)

    # layer 2: hid2 as one fused K=384 contraction; column 32 carries the
    # action tail (hid8 @ hid9_action folded) plus the folded scalar bias.
    t = (jnp.dot(h1.astype(bf16), wb_ref[0:NA, :N_MID],
                 preferred_element_type=f32) + b_ref[1:2, :N_MID])  # (TB, 33)
    h2 = jnp.maximum(t[:, :32], 0.0)
    tail = t[:, 32:33]

    # layer 3: hid4 -> relu
    h4 = jnp.maximum(
        jnp.dot(h2.astype(bf16), wb_ref[R_W4:R_W4 + 32, :64],
                preferred_element_type=f32) + b_ref[2:3, :64], 0.0)  # (TB, 64)

    # layer 4: folded hid6 @ hid9_state, add action tail, tanh
    qpre = (jnp.dot(h4.astype(bf16), wb_ref[R_W69:R_W69 + 64, :1],
                    preferred_element_type=f32) + tail)              # (TB, 1)
    q_ref[...] = jnp.tanh(qpre)


# ------------------- one-time parameter preparation (hoisted) ----------------
def prepare_params(params, weight_dtype=jnp.bfloat16):
    """Re-layout + fold PyTorch-shaped parameters into packed slabs.
    Done once at load time; NOT inside the jit'd forward."""
    (W1, b1, W2, b2, W4, b4, W6, b6, Wc2, bc2, W8, b8, W9, b9) = [
        np.asarray(p, np.float32) for p in params]
    c = W1.shape[1]
    assert c == C, "packed layout below assumes dim_of_state[0] == 4"
    assert A_OFF + c <= XCOLS

    # ---- slab A (128, 384): conv1 folded + conv2 (1x1) on the action cols ---
    # conv1: column j = (h*2+w)*32 + co, row = ci*20 + h*4 + (w+kw)
    # (matches x.reshape(B, C*5*4) flattening).
    wa = np.zeros((XCOLS, NA), np.float32)
    for h in range(5):
        for w in range(2):
            hw = h * 2 + w
            for ci in range(c):
                for kw in range(3):
                    wa[ci * 20 + h * 4 + w + kw,
                       hw * 32:(hw + 1) * 32] = W1[:, ci, 0, kw]
    # conv2 (1x1): action lives in x columns 80..83 -> h1 columns 320..331
    wa[A_OFF:A_OFF + c, H1_ACT:H1_ACT + 12] = Wc2.reshape(12, c).T

    # ---- slab B (480, 64): hid2 fused contraction + folded linear tail ------
    wb = np.zeros((WB_ROWS, WB_COLS), np.float32)
    # hid2: rows j = (kh*2+kw)*32 + ci (same hw ordering as slab-A columns)
    wb[0:320, 0:32] = np.transpose(W2, (2, 3, 1, 0)).reshape(320, 32)
    # folded action tail: hid8^T @ hid9_action  (contracts h1 cols 320..331)
    wb[H1_ACT:H1_ACT + 12, 32:33] = W8.T @ W9[:, 12:].T
    # hid4
    wb[R_W4:R_W4 + 32, 0:64] = W4.T
    # folded state tail: hid6^T @ hid9_state
    wb[R_W69:R_W69 + 64, 0:1] = W6.T @ W9[:, :12].T

    # ---- bias slab (8, 384) f32 ---------------------------------------------
    bs = np.zeros((8, NA), np.float32)
    bs[0, 0:320] = np.tile(b1, 10)
    bs[0, H1_ACT:H1_ACT + 12] = bc2
    bs[1, 0:32] = b2
    bs[1, 32] = float(b6 @ W9[0, :12] + b8 @ W9[0, 12:] + b9[0])  # folded bias
    bs[2, 0:64] = b4
    return (jnp.asarray(wa, weight_dtype), jnp.asarray(wb, weight_dtype),
            jnp.asarray(bs, jnp.float32))


# ------------------------------ forward wrappers ------------------------------
def _pick_tb(batch):
    """Batch rows per grid step: ~half the padded batch (>=2 'parallel' steps
    for v7x's two TensorCores), multiple of 32, capped at 512."""
    b32 = ((max(int(batch), 1) + 31) // 32) * 32
    if b32 <= 32:
        return 32
    half = ((b32 // 2 + 31) // 32) * 32
    return int(min(512, half))


def portfolio_forward_batched(x, a, prep):
    """x: (B, C, 5, 4) NCHW, a: (B, C).  Returns (B,) Q values."""
    wa, wb, bs = prep
    B = x.shape[0]
    TB = _pick_tb(B)
    Bp = ((B + TB - 1) // TB) * TB

    # Pack [state(80) | action(4) | zeros(44)] into one lane-dense bf16 operand.
    xs = x.reshape(B, A_OFF).astype(jnp.bfloat16)
    av = a.reshape(B, C).astype(jnp.bfloat16)
    xf = jnp.concatenate(
        [xs, av, jnp.zeros((B, XCOLS - A_OFF - C), jnp.bfloat16)], axis=1)
    if Bp != B:
        xf = jnp.pad(xf, ((0, Bp - B), (0, 0)))

    q = pl.pallas_call(
        portfolio_kernel,
        out_shape=jax.ShapeDtypeStruct((Bp, 1), jnp.float32),
        grid=(Bp // TB,),
        in_specs=[
            pl.BlockSpec((TB, XCOLS), lambda i: (i, 0)),        # packed x rows
            pl.BlockSpec((XCOLS, NA), lambda i: (0, 0)),        # slab A (const)
            pl.BlockSpec((WB_ROWS, WB_COLS), lambda i: (0, 0)),  # slab B (const)
            pl.BlockSpec((8, NA), lambda i: (0, 0)),            # bias slab
        ],
        out_specs=pl.BlockSpec((TB, 1), lambda i: (i, 0)),
        compiler_params=pltpu.CompilerParams(
            dimension_semantics=("parallel",)),                  # v7x: 2 TCs
    )(xf, wa, wb, bs)
    return q[:B, 0]


def portfolio_forward(x, a, prep):
    """Single-sample module semantics. x: (1, C, 5, 4), a: (C,). Returns scalar Q."""
    q = portfolio_forward_batched(x.reshape(1, C, 5, 4), a.reshape(1, C), prep)
    return q[0]


# ------------------------- pure-JAX reference (check) -------------------------
def reference_forward(x, a, params):
    (W1, b1, W2, b2, W4, b4, W6, b6, Wc2, bc2, W8, b8, W9, b9) = params
    dn = ('NCHW', 'OIHW', 'NCHW')
    hi = jax.lax.Precision.HIGHEST
    s = jax.lax.conv_general_dilated(x, W1, (1, 1), 'VALID',
                                     dimension_numbers=dn, precision=hi)
    s = jnp.maximum(s + b1[None, :, None, None], 0.0)
    s = jax.lax.conv_general_dilated(s, W2, (1, 1), 'VALID',
                                     dimension_numbers=dn, precision=hi)
    s = jnp.maximum(s + b2[None, :, None, None], 0.0).reshape(-1, 32)
    s = jnp.maximum(jnp.dot(s, W4.T, precision=hi) + b4, 0.0)
    s = jnp.dot(s, W6.T, precision=hi) + b6
    act = a.reshape(-1, C, 1, 1)
    act = jax.lax.conv_general_dilated(act, Wc2, (1, 1), 'VALID',
                                       dimension_numbers=dn, precision=hi)
    act = jnp.maximum(act + bc2[None, :, None, None], 0.0).reshape(1, -1)
    act = jnp.dot(act, W8.T, precision=hi) + b8
    comb = jnp.concatenate([s.reshape(act.shape[0], -1),
                            act.reshape(act.shape[0], -1)], axis=1)
    return jnp.tanh(jnp.dot(comb, W9.T, precision=hi) + b9)[0, 0]


# ----------------------------------- main -------------------------------------
if __name__ == "__main__":
    key = jax.random.PRNGKey(0)
    ks = jax.random.split(key, 20)
    f32 = jnp.float32

    # Deterministic synthetic parameters (PyTorch module shapes).
    W1 = 0.20 * jax.random.normal(ks[0], (32, C, 1, 3), f32)
    b1 = 0.10 * jax.random.normal(ks[1], (32,), f32)
    W2 = 0.10 * jax.random.normal(ks[2], (32, 32, 5, 2), f32)
    b2 = 0.10 * jax.random.normal(ks[3], (32,), f32)
    W4 = 0.10 * jax.random.normal(ks[4], (64, 32), f32)
    b4 = 0.10 * jax.random.normal(ks[5], (64,), f32)
    W6 = 0.10 * jax.random.normal(ks[6], (12, 64), f32)
    b6 = 0.10 * jax.random.normal(ks[7], (12,), f32)
    Wc2 = 0.20 * jax.random.normal(ks[8], (12, C, 1, 1), f32)
    bc2 = 0.10 * jax.random.normal(ks[9], (12,), f32)
    W8 = 0.20 * jax.random.normal(ks[10], (12, 12), f32)
    b8 = 0.10 * jax.random.normal(ks[11], (12,), f32)
    W9 = 0.20 * jax.random.normal(ks[12], (1, 24), f32)
    b9 = 0.10 * jax.random.normal(ks[13], (1,), f32)
    params = (W1, b1, W2, b2, W4, b4, W6, b6, Wc2, bc2, W8, b8, W9, b9)

    # One-time weight re-layout / folding / packing (hoisted out of the jit).
    prep = prepare_params(params)

    # Batched inputs: X -> (B, C, 5, 4) NCHW, a -> (B, C).
    B = 128      # -> TB = 64, grid = 2 parallel steps
    x = jax.random.normal(ks[14], (B, C, 5, 4), f32)
    a = jax.random.uniform(ks[15], (B, C), f32)

    fwd = jax.jit(portfolio_forward_batched)
    q_kernel = fwd(x, a, prep)
    jax.block_until_ready(q_kernel)

    # Single-sample path (original module forward semantics).
    q_single = jax.jit(portfolio_forward)(x[0], a[0], prep)
    jax.block_until_ready(q_single)

    # Pure-JAX reference (HIGHEST precision), per sample.
    q_ref = jax.vmap(lambda xi, ai: reference_forward(xi[None], ai, params))(x, a)
    jax.block_until_ready(q_ref)

    assert np.all(np.isfinite(np.asarray(q_kernel)))
    # Tolerance reflects bf16 weight/activation storage (f32 accumulation);
    # layout bugs would produce O(0.1-1) errors and still be caught.
    np.testing.assert_allclose(np.asarray(q_kernel), np.asarray(q_ref),
                               rtol=3e-2, atol=3e-2)
    np.testing.assert_allclose(float(q_single), float(q_ref[0]),
                               rtol=3e-2, atol=3e-2)
    print("KERNEL_OK")
</pallas_src>

<mosaic_0001>
module attributes {stable_mosaic.version = 11 : i64} {
  func.func @portfolio_kernel(%arg0: i32, %arg1: memref<64x128xbf16, #tpu.memory_space<vmem>>, %arg2: memref<128x384xbf16, #tpu.memory_space<vmem>>, %arg3: memref<480x64xbf16, #tpu.memory_space<vmem>>, %arg4: memref<8x384xf32, #tpu.memory_space<vmem>>, %arg5: memref<64x1xf32, #tpu.memory_space<vmem>>) attributes {dimension_semantics = [#tpu.dimension_semantics<parallel>], iteration_bounds = array<i64: 2>, scalar_prefetch = 0 : i64, scratch_operands = 0 : i64, tpu.core_type = #tpu.core_type<tc>, window_params = [{transform_indices = @transform_0, window_bounds = array<i64: 64, 128>}, {pipeline_mode = #tpu.pipeline_mode<synchronous>, transform_indices = @transform_1, window_bounds = array<i64: 128, 384>}, {pipeline_mode = #tpu.pipeline_mode<synchronous>, transform_indices = @transform_2, window_bounds = array<i64: 480, 64>}, {pipeline_mode = #tpu.pipeline_mode<synchronous>, transform_indices = @transform_3, window_bounds = array<i64: 8, 384>}, {transform_indices = @transform_4, window_bounds = array<i64: 64, 1>}]} {
    %c0 = arith.constant 0 : index
    %c0_0 = arith.constant 0 : index
    %0 = vector.load %arg1[%c0, %c0_0] : memref<64x128xbf16, #tpu.memory_space<vmem>>, vector<64x128xbf16>
    %c0_1 = arith.constant 0 : index
    %c0_2 = arith.constant 0 : index
    %1 = vector.load %arg2[%c0_1, %c0_2] : memref<128x384xbf16, #tpu.memory_space<vmem>>, vector<128x384xbf16>
    %cst = arith.constant dense<0.000000e+00> : vector<64x384xf32>
    %2 = tpu.matmul %0, %1, %cst {dimension_numbers = #tpu.dot_dimension_numbers<[1], [0], [0], [1], [0, 0, 1, 1], [], []>} : vector<64x128xbf16>, vector<128x384xbf16>, vector<64x384xf32> -> vector<64x384xf32>
    %c0_3 = arith.constant 0 : index
    %c0_4 = arith.constant 0 : index
    %3 = vector.load %arg4[%c0_3, %c0_4] : memref<8x384xf32, #tpu.memory_space<vmem>>, vector<1x384xf32>
    %4 = vector.broadcast %3 : vector<1x384xf32> to vector<64x384xf32>
    %5 = arith.addf %2, %4 : vector<64x384xf32>
    %cst_5 = arith.constant 0.000000e+00 : f32
    %6 = vector.broadcast %cst_5 : f32 to vector<64x384xf32>
    %7 = arith.maximumf %5, %6 : vector<64x384xf32>
    %8 = arith.truncf %7 : vector<64x384xf32> to vector<64x384xbf16>
    %c0_6 = arith.constant 0 : index
    %c0_7 = arith.constant 0 : index
    %9 = vector.load %arg3[%c0_6, %c0_7] : memref<480x64xbf16, #tpu.memory_space<vmem>>, vector<384x33xbf16>
    %cst_8 = arith.constant dense<0.000000e+00> : vector<64x33xf32>
    %10 = tpu.matmul %8, %9, %cst_8 {dimension_numbers = #tpu.dot_dimension_numbers<[1], [0], [0], [1], [0, 0, 1, 1], [], []>} : vector<64x384xbf16>, vector<384x33xbf16>, vector<64x33xf32> -> vector<64x33xf32>
    %c1 = arith.constant 1 : index
    %c0_9 = arith.constant 0 : index
    %11 = vector.load %arg4[%c1, %c0_9] : memref<8x384xf32, #tpu.memory_space<vmem>>, vector<1x33xf32>
    %12 = vector.broadcast %11 : vector<1x33xf32> to vector<64x33xf32>
    %13 = arith.addf %10, %12 : vector<64x33xf32>
    %14 = vector.extract_strided_slice %13 {offsets = [0, 0], sizes = [64, 32], strides = [1, 1]} : vector<64x33xf32> to vector<64x32xf32>
    %cst_10 = arith.constant 0.000000e+00 : f32
    %15 = vector.broadcast %cst_10 : f32 to vector<64x32xf32>
    %16 = arith.maximumf %14, %15 : vector<64x32xf32>
    %17 = vector.extract_strided_slice %13 {offsets = [0, 32], sizes = [64, 1], strides = [1, 1]} : vector<64x33xf32> to vector<64x1xf32>
    %18 = arith.truncf %16 : vector<64x32xf32> to vector<64x32xbf16>
    %c384 = arith.constant 384 : index
    %c0_11 = arith.constant 0 : index
    %19 = vector.load %arg3[%c384, %c0_11] : memref<480x64xbf16, #tpu.memory_space<vmem>>, vector<32x64xbf16>
    %cst_12 = arith.constant dense<0.000000e+00> : vector<64x64xf32>
    %20 = tpu.matmul %18, %19, %cst_12 {dimension_numbers = #tpu.dot_dimension_numbers<[1], [0], [0], [1], [0, 0, 1, 1], [], []>} : vector<64x32xbf16>, vector<32x64xbf16>, vector<64x64xf32> -> vector<64x64xf32>
    %c2 = arith.constant 2 : index
    %c0_13 = arith.constant 0 : index
    %21 = vector.load %arg4[%c2, %c0_13] : memref<8x384xf32, #tpu.memory_space<vmem>>, vector<1x64xf32>
    %22 = vector.broadcast %21 : vector<1x64xf32> to vector<64x64xf32>
    %23 = arith.addf %20, %22 : vector<64x64xf32>
    %cst_14 = arith.constant 0.000000e+00 : f32
    %24 = vector.broadcast %cst_14 : f32 to vector<64x64xf32>
    %25 = arith.maximumf %23, %24 : vector<64x64xf32>
    %26 = arith.truncf %25 : vector<64x64xf32> to vector<64x64xbf16>
    %c416 = arith.constant 416 : index
    %c0_15 = arith.constant 0 : index
    %27 = vector.load %arg3[%c416, %c0_15] : memref<480x64xbf16, #tpu.memory_space<vmem>>, vector<64x1xbf16>
    %cst_16 = arith.constant dense<0.000000e+00> : vector<64x1xf32>
    %28 = tpu.matmul %26, %27, %cst_16 {dimension_numbers = #tpu.dot_dimension_numbers<[1], [0], [0], [1], [0, 0, 1, 1], [], []>} : vector<64x64xbf16>, vector<64x1xbf16>, vector<64x1xf32> -> vector<64x1xf32>
    %29 = arith.addf %28, %17 : vector<64x1xf32>
    %30 = math.tanh %29 : vector<64x1xf32>
    %c0_17 = arith.constant 0 : index
    %c0_18 = arith.constant 0 : index
    %31 = vector.load %arg5[%c0_17, %c0_18] : memref<64x1xf32, #tpu.memory_space<vmem>>, vector<64x1xf32>
    tpu.vector_store %arg5[%c0_17, %c0_18], %30 {strides = array<i32>} : memref<64x1xf32, #tpu.memory_space<vmem>>, vector<64x1xf32>,
    return
  }
  func.func @transform_0(%arg0: i32) -> (i32, i32) {
    %c0_i32 = arith.constant 0 : i32
    %c0_i32_0 = arith.constant 0 : i32
    return %arg0, %c0_i32 : i32, i32
  }
  func.func @transform_1(%arg0: i32) -> (i32, i32) {
    %c0_i32 = arith.constant 0 : i32
    %c0_i32_0 = arith.constant 0 : i32
    %c0_i32_1 = arith.constant 0 : i32
    return %c0_i32, %c0_i32_0 : i32, i32
  }
  func.func @transform_2(%arg0: i32) -> (i32, i32) {
    %c0_i32 = arith.constant 0 : i32
    %c0_i32_0 = arith.constant 0 : i32
    %c0_i32_1 = arith.constant 0 : i32
    return %c0_i32, %c0_i32_0 : i32, i32
  }
  func.func @transform_3(%arg0: i32) -> (i32, i32) {
    %c0_i32 = arith.constant 0 : i32
    %c0_i32_0 = arith.constant 0 : i32
    %c0_i32_1 = arith.constant 0 : i32
    return %c0_i32, %c0_i32_0 : i32, i32
  }
  func.func @transform_4(%arg0: i32) -> (i32, i32) {
    %c0_i32 = arith.constant 0 : i32
    %c0_i32_0 = arith.constant 0 : i32
    return %arg0, %c0_i32 : i32, i32
  }
}

</mosaic_0001>

<bundles_post_ra>
// kernel: portfolio_forward_batched.1
= control target key start
LH: loop header
LB: loop body
LE: loop exit
PB: predicated region body
PF: predicated region fallthrough
CT: control target
= control target key end

     0   :  { %s1608_s15 = smov 0   ;;  %s1874_s0 = inlined_call_operand.vmem [shape: bf16[128,128], index: 0, kind: input, shape index: {}]   ;;  %s1875_s1 = inlined_call_operand.vmem [shape: bf16[128,384], index: 1, kind: input, shape index: {}]   ;;  %s1876_s2 = inlined_call_operand.vmem [shape: bf16[480,64], index: 2, kind: input, shape index: {}]   ;;  %s1877_s3 = inlined_call_operand.vmem [shape: f32[8,384], index: 3, kind: input, shape index: {}]   ;;  %s1878_s4 = inlined_call_operand.vmem [shape: f32[128,1], index: 4, kind: output, shape index: {}]  }
   0x1 LB: > { %s1242_s16 = sadd.s32 4294967295, %s1579_s15   ;;  %p1246_p0 = scmp.ge.s32.totalorder %s1579_s15, 1  ;;  %s1579_s15 = sphi %s1608_s15, %s14_s15  }
   0x2   : > { %p163_p1 = scmp.lt.s32.totalorder %s1579_s15, 3 }
   0x4   : > { %p164_p2 = pnand %p1246_p0, %p163_p1 }
   0x5   : > { %v1491_v0 = vld [vmem:[%s1875_s1 + $0x4] ss:$12 sps:$4 sm:$0xff] (!%p164_p2)   ;;  %v1493_v1 = vld [vmem:[%s1875_s1] ss:$12 sps:$4 sm:$0xff] (!%p164_p2)   ;;  %v1581_v2 = vmov (!%p164_p2), 0   ;;  %s1247_s21 = sshll.u32 (!%p164_p2), %s1242_s16, 3  ;;  %v244_v53 = vlaneseq (!%p164_p2) }
   0x6   : > { %167 = sbr.rel (%p164_p2) target bundleno = 960 (0x3c0), region = 36  ;;  %443 = vmatprep.mubr.bf16.mxu0 (!%p164_p2), %v1581_v2  ;;  %411 = vmatprep.subr.bf16.mxu0 (!%p164_p2), %v1491_v0  ;;  %v1494_v3 = vld [vmem:[%s1875_s1 + $0x1c] ss:$12 sps:$4 sm:$0xff] (!%p164_p2)   ;;  %v1497_v5 = vld [vmem:[%s1875_s1 + $0x18] ss:$12 sps:$4 sm:$0xff] (!%p164_p2)   ;;  %p190_p3 = scmp.lt.s32.totalorder (!%p164_p2), %s1247_s21, 15 }
   0x7   : > { %412 = vmatpush1.bf16.msra.mxu0 (!%p164_p2), %v1493_v1  ;;  %v1496_v4 = vld [vmem:[%s1875_s1 + $0x8] ss:$12 sps:$4 sm:$0xff] (!%p164_p2)   ;;  %v1500_v7 = vld [vmem:[%s1875_s1 + $0x20] ss:$12 sps:$4 sm:$0xff] (!%p164_p2)   ;;  %v1501_v8 = vld [vmem:[%s1875_s1 + $0x30] ss:$12 sps:$4 sm:$0xff] (!%p164_p2)  }
   0x8   : > { %413 = vmatprep.subr.bf16.mxu0 (!%p164_p2), %v1494_v3  ;;  %v1498_v6 = vld [vmem:[%s1875_s1 + $0x34] ss:$12 sps:$4 sm:$0xff] (!%p164_p2)   ;;  %1397 = vmatprep.subr.bf16.mxu1 (!%p164_p2), %v1496_v4  ;;  %v1504_v9 = vld [vmem:[%s1875_s1 + $0x38] ss:$12 sps:$4 sm:$0xff] (!%p164_p2)   ;;  %v1508_v12 = vld [vmem:[%s1875_s1 + $0x50] ss:$12 sps:$4 sm:$0xff] (!%p164_p2)  }
   0x9   : > { %1398 = vmatpush3.bf16.msra.mxu1 (!%p164_p2), %v1496_v4  ;;  %v1502_v10 = vld [vmem:[%s1875_s1 + $0x4c] ss:$12 sps:$4 sm:$0xff] (!%p164_p2)   ;;  %v1505_v11 = vld [vmem:[%s1875_s1 + $0x48] ss:$12 sps:$4 sm:$0xff] (!%p164_p2)   ;;  %v1506_v13 = vld [vmem:[%s1875_s1 + $0x64] ss:$12 sps:$4 sm:$0xff] (!%p164_p2)  }
   0xa   : > { %1399 = vmatprep.subr.bf16.mxu1 (!%p164_p2), %v1500_v7  ;;  %v1509_v14 = vld [vmem:[%s1875_s1 + $0x60] ss:$12 sps:$4 sm:$0xff] (!%p164_p2)   ;;  %v1512_v15 = vld [vmem:[%s1875_s1 + $0x68] ss:$12 sps:$4 sm:$0xff] (!%p164_p2)   ;;  %v1513_v17 = vld [vmem:[%s1875_s1 + $0x78] ss:$12 sps:$4 sm:$0xff] (!%p164_p2)  }
   0xb   : > { %414 = vmatpush1.bf16.msra.mxu0 (!%p164_p2), %v1497_v5  ;;  %v1510_v16 = vld [vmem:[%s1875_s1 + $0x7c] ss:$12 sps:$4 sm:$0xff] (!%p164_p2)   ;;  %v1516_v19 = vld [vmem:[%s1875_s1 + $0x80] ss:$12 sps:$4 sm:$0xff] (!%p164_p2)   ;;  %v1520_v22 = vld [vmem:[%s1875_s1 + $0x98] ss:$12 sps:$4 sm:$0xff] (!%p164_p2)  }
   0xc   : > { %415 = vmatprep.subr.bf16.mxu0 (!%p164_p2), %v1498_v6  ;;  %v1514_v20 = vld [vmem:[%s1875_s1 + $0x94] ss:$12 sps:$4 sm:$0xff] (!%p164_p2)   ;;  %v1517_v21 = vld [vmem:[%s1875_s1 + $0x90] ss:$12 sps:$4 sm:$0xff] (!%p164_p2)   ;;  %v1518_v23 = vld [vmem:[%s1875_s1 + $0xac] ss:$12 sps:$4 sm:$0xff] (!%p164_p2)  }
   0xd   : > { %s1880_s21 = smov (!%p190_p3, %s1247_s21), 15  ;;  %1400 = vmatpush3.bf16.msra.mxu1 %v1500_v7  ;;  %v1521_v24 = vld [vmem:[%s1875_s1 + $0xa8] ss:$12 sps:$4 sm:$0xff]   ;;  %v1523_v25 = vld [vmem:[%s1875_s1 + $0xb0] ss:$12 sps:$4 sm:$0xff]   ;;  %v1527_v26 = vld [vmem:[%s1876_s2 + $0x40] sm:$0xff]  }
   0xe   : > { %1401 = vmatprep.subr.bf16.mxu1 %v1504_v9  ;;  %s1248_s19 = sshll.u32 %s1880_s21, 2  ;;  %v1528_v27 = vld [vmem:[%s1876_s2] sm:$0xff]   ;;  %v1529_v28 = vld [vmem:[%s1876_s2 + $0x48] sm:$0xff]   ;;  %v1532_v34 = vld [vmem:[%s1876_s2 + $0x50] sm:$0xff]   ;;  %v245_v54 = vshrl.u32 %v244_v53, 7  ;;  %s1582_s5 = smov 96  }
   0xf   : > { %416 = vmatpush1.bf16.msra.mxu0 %v1501_v8  ;;  %s1668_s27 = scalar_lea.vmem %s1874_s0, %s1248_s19  ;;  %v1531_v29 = vld [vmem:[%s1876_s2 + $0x80] sm:$0xff]   ;;  %v1530_v32 = vld [vmem:[%s1876_s2 + $0x8] sm:$0xff]   ;;  %v1533_v35 = vld [vmem:[%s1876_s2 + $0x10] sm:$0xff]   ;;  %vm937_vm0 = vcmask 261120   ;;  %vm1091_vm1 = vcmask 523264   ;;  %s1250_s17 = sshll.u32 %s1880_s21, 3 }
  0x10   : > { %417 = vmatprep.subr.bf16.mxu0 %v1502_v10  ;;  %v1522_v18 = vld [vmem:[%s1668_s27] sm:$0xff]   ;;  %v1524_v30 = vld [vmem:[%s1668_s27 + $0x8] sm:$0xff]   ;;  %v1525_v31 = vld [vmem:[%s1668_s27 + $0x10] sm:$0xff]   ;;  %v246_v55 = vsub.s32 0, %v245_v54  ;;  %v250_v57 = vsub.s32 1, %v245_v54  ;;  %v254_v58 = vsub.s32 2, %v245_v54  ;;  %s1853_s20 = scalar_lea.vmem %s1878_s4, %s1250_s17 }
  0x11   : > { %1402 = vmatpush3.bf16.msra.mxu1 %v1504_v9  ;;  %1413 = vmatprep.mubr.bf16.mxu1 %v1522_v18  ;;  %v1534_v33 = vld [vmem:[%s1876_s2 + $0x88] sm:$0xff]   ;;  %v1526_v36 = vld [vmem:[%s1668_s27 + $0x18] sm:$0xff]   ;;  %v1537_v38 = vld [vmem:[%s1876_s2 + $0x90] sm:$0xff]   ;;  %vm1177_vm2 = vcmask 7168  }
  0x12   : > { %1403 = vmatprep.subr.bf16.mxu1 %v1508_v12  ;;  %v1535_v37 = vld [vmem:[%s1876_s2 + $0x58] sm:$0xff]   ;;  %v1538_v41 = vld [vmem:[%s1876_s2 + $0x60] sm:$0xff]   ;;  %v1541_v43 = vld [vmem:[%s1876_s2 + $0x68] sm:$0xff]  }
  0x13   : > { %418 = vmatpush1.bf16.msra.mxu0 %v1505_v11  ;;  %v1536_v39 = vld [vmem:[%s1876_s2 + $0x18] sm:$0xff]   ;;  %v1539_v42 = vld [vmem:[%s1876_s2 + $0x20] sm:$0xff]   ;;  %v1542_v45 = vld [vmem:[%s1876_s2 + $0x28] sm:$0xff]  }
  0x14   : > { %419 = vmatprep.subr.bf16.mxu0 %v1506_v13  ;;  %v1540_v40 = vld [vmem:[%s1876_s2 + $0x98] sm:$0xff]   ;;  %v1543_v44 = vld [vmem:[%s1876_s2 + $0xa0] sm:$0xff]   ;;  %v1544_v46 = vld [vmem:[%s1876_s2 + $0x70] sm:$0xff]  }
  0x15   : > { %1404 = vmatpush3.bf16.msra.mxu1 %v1508_v12  ;;  %v1546_v47 = vld [vmem:[%s1876_s2 + $0xa8] sm:$0xff]   ;;  %v1545_v48 = vld [vmem:[%s1876_s2 + $0x30] sm:$0xff]   ;;  %v1547_v49 = vld [vmem:[%s1876_s2 + $0x78] sm:$0xff]  }
  0x16   : > { %1405 = vmatprep.subr.bf16.mxu1 %v1512_v15  ;;  %v1549_v50 = vld [vmem:[%s1876_s2 + $0xb0] sm:$0xff]   ;;  %v1548_v51 = vld [vmem:[%s1876_s2 + $0x38] sm:$0xff]  }
  0x17   : > { %420 = vmatpush1.bf16.msra.mxu0 %v1509_v14  ;;  %v1550_v52 = vld [vmem:[%s1876_s2 + $0xb8] sm:$0xff]   ;;  %v242_v56 = vld [vmem:[%s1877_s3] ss:$8 sm:$0x7] }
  0x18   : > { %421 = vmatprep.subr.bf16.mxu0 %v1510_v16  ;;  %v1779_v59 = vrot.slane %v242_v56, %v246_v55  ;;  %v1781_v60 = vrot.slane %v242_v56, %v250_v57  ;;  %v255_v62 = vrot.slane %v242_v56, %v254_v58 }
  0x19   : > { %1406 = vmatpush3.bf16.msra.mxu1 %v1512_v15 }
  0x1a   : > { %1407 = vmatprep.subr.bf16.mxu1 %v1516_v19 }
  0x1b   : > { %422 = vmatpush1.bf16.msra.mxu0 %v1513_v17 }
  0x1c   : > { %423 = vmatprep.subr.bf16.mxu0 %v1514_v20 }
  0x1d   : > { %1408 = vmatpush3.bf16.msra.mxu1 %v1516_v19 }
  0x1e   : > { %1409 = vmatprep.subr.bf16.mxu1 %v1520_v22 }
  0x1f   : > { %424 = vmatpush1.bf16.msra.mxu0 %v1517_v21 }
  0x20   : > { %425 = vmatprep.subr.bf16.mxu0 %v1518_v23 }
  0x21   : > { %1410 = vmatpush3.bf16.msra.mxu1 %v1520_v22 }
  0x22   : > { %1411 = vmatprep.subr.bf16.mxu1 %v1523_v25 }
  0x23   : > { %426 = vmatpush1.bf16.msra.mxu0 %v1521_v24 }
  0x24   : > { %1331 = vmatprep.subr.bf16.mxu0 %v1527_v26 }
  0x25   : > { %1412 = vmatpush3.bf16.msra.mxu1 %v1523_v25 }
  0x26   : > { %444 = vmatmul.mubr.bf16.vlgmr.msra.gmra.mrb[0].mxu0 %v1522_v18  ;;  %1421 = vmatprep.subr.bf16.mxu1 %v1531_v29 }
  0x27   : > { %453 = vmatprep.mubr.bf16.mxu0 %v1581_v2  ;;  %1332 = vmatpush3.bf16.msra.mxu0 %v1528_v27 }
  0x28   : > { %1333 = vmatprep.subr.bf16.mxu0 %v1529_v28  ;;  %1414 = vmatmul.mubr.bf16.vlgmr.msra.gmra.mrb[0].mxu1 %v1524_v30 }
  0x29   : > { %1417 = vmatprep.mubr.bf16.mxu1 %v1525_v31  ;;  %1422 = vmatpush3.bf16.msra.mxu1 %v1531_v29 }
  0x2a   : > { %1423 = vmatprep.subr.bf16.mxu1 %v1534_v33 }
  0x2b   : > { %1334 = vmatpush3.bf16.msra.mxu0 %v1530_v32 }
  0x2c   : > { %1335 = vmatprep.subr.bf16.mxu0 %v1532_v34 }
  0x2d   : > { %1424 = vmatpush3.bf16.msra.mxu1 %v1534_v33 }
  0x2e   : > { %454 = vmatmul.mubr.bf16.gmra.mrb[4].mxu0 %v1524_v30  ;;  %1425 = vmatprep.subr.bf16.mxu1 %v1537_v38 }
  0x2f   : > { %463 = vmatprep.mubr.bf16.mxu0 %v1581_v2  ;;  %1336 = vmatpush3.bf16.msra.mxu0 %v1533_v35 }
  0x30   : > { %1337 = vmatprep.subr.bf16.mxu0 %v1535_v37  ;;  %1418 = vmatmul.mubr.bf16.gmra.mrb[4].mxu1 %v1526_v36 }
  0x31   : > { %1426 = vmatpush3.bf16.msra.mxu1 %v1537_v38 }
  0x32   : > { %1427 = vmatprep.subr.bf16.mxu1 %v1540_v40 }
  0x33   : > { %1338 = vmatpush3.bf16.msra.mxu0 %v1536_v39 }
  0x34   : > { %1339 = vmatprep.subr.bf16.mxu0 %v1538_v41 }
  0x35   : > { %1428 = vmatpush3.bf16.msra.mxu1 %v1540_v40 }
  0x36   : > { %464 = vmatmul.mubr.bf16.gmra.mrb[8].mxu0 %v1525_v31  ;;  %1429 = vmatprep.subr.bf16.mxu1 %v1543_v44 }
  0x37   : > { %473 = vmatprep.mubr.bf16.mxu0 %v1581_v2  ;;  %1340 = vmatpush3.bf16.msra.mxu0 %v1539_v42 }
  0x38   : > { %1341 = vmatprep.subr.bf16.mxu0 %v1541_v43 }
  0x39   : > { %1430 = vmatpush3.bf16.msra.mxu1 %v1543_v44 }
  0x3a   : > { %1431 = vmatprep.subr.bf16.mxu1 %v1546_v47 }
  0x3b   : > { %1342 = vmatpush3.bf16.msra.mxu0 %v1542_v45 }
  0x3c   : > { %1343 = vmatprep.subr.bf16.mxu0 %v1544_v46 }
  0x3d   : > { %1432 = vmatpush3.bf16.msra.mxu1 %v1546_v47 }
  0x3e   : > { %474 = vmatmul.mubr.bf16.gmra.mrb[12].mxu0 %v1526_v36  ;;  %1433 = vmatprep.subr.bf16.mxu1 %v1549_v50 }
  0x3f   : > { %1344 = vmatpush3.bf16.msra.mxu0 %v1545_v48 }
  0x40   : > { %1345 = vmatprep.subr.bf16.mxu0 %v1547_v49 }
  0x41   : > { %1434 = vmatpush3.bf16.msra.mxu1 %v1549_v50 }
  0x42   : > { %1435 = vmatprep.subr.bf16.mxu1 %v1550_v52 }
  0x43   : > { %1346 = vmatpush3.bf16.msra.mxu0 %v1548_v51 }
  0x45   : > { %1436 = vmatpush3.bf16.msra.mxu1 %v1550_v52 }
  0xf9   : > { %v445_v61 = vpop.f32.mrb[0].mxu0 }
  0xfa   : > { %v446_v63 = vadd.f32 %v445_v61, %v1779_v59  ;;  %v447_v0 = vpop.f32.mrb[1].mxu0 }
  0xfb   : > { %v448_v1 = vadd.f32 %v447_v0, %v1781_v60  ;;  %v449_v2 = vpop.f32.mrb[2].mxu0  ;;  %v1415_v5 = vpop.f32.mrb[0].mxu1 }
  0xfc   : > { %v450_v3 = vadd.f32 %v449_v2, %v1779_v59  ;;  %v451_v4 = vpop.f32.mrb[3].mxu0  ;;  %v527_v7 = vadd.f32 %v1415_v5, %v255_v62  ;;  %v518_v8 = vpop.f32.mrb[1].mxu1  ;;  %v549_v9 = vmax.f32 %v446_v63, 0.0 }
  0xfd   : > { %v452_v6 = vadd.f32 %v451_v4, %v1781_v60  ;;  %v519_v11 = vadd.f32 %v518_v8, %v255_v62  ;;  %v1416_v12 = vpop.f32.mrb[2].mxu1  ;;  %v550_v13 = vmax.f32 %v448_v1, 0.0 }
  0xfe   : > { %v552_v10 = vmax.f32 %v450_v3, 0.0  ;;  %v557_v15 = vmax.f32 %v527_v7, 0.0  ;;  %v530_v16 = vadd.f32 %v1416_v12, %v255_v62  ;;  %v521_v17 = vpop.f32.mrb[3].mxu1 }
  0xff   : > { %v553_v14 = vmax.f32 %v452_v6, 0.0  ;;  %v551_v19 = vmax.f32 %v519_v11, 0.0  ;;  %v522_v20 = vadd.f32 %v521_v17, %v255_v62 }
 0x100   : > { %v573_v18 = vpack.c.bf16 %v552_v10, %v549_v9  ;;  %v560_v22 = vmax.f32 %v530_v16, 0.0 }
 0x101   : > { %v574_v21 = vpack.c.bf16 %v553_v14, %v550_v13  ;;  %v455_v23 = vpop.f32.mrb[4].mxu0  ;;  %v554_v24 = vmax.f32 %v522_v20, 0.0  ;;  %v1551_v20 = vld [vmem:[%s1876_s2 + $0xc0] sm:$0xff]  }
 0x102   : > { %v456_v25 = vadd.f32 %v455_v23, %v1779_v59  ;;  %v457_v26 = vpop.f32.mrb[5].mxu0  ;;  %v578_v27 = vpack.c.bf16 %v560_v22, %v557_v15  ;;  %1445 = vmatprep.subr.bf16.mxu1 %v1551_v20  ;;  %v1808_v22 = vld [vmem:[%s1877_s3 + $0x1] ss:$0 sm:$0xff] }
 0x103   : > { %v458_v28 = vadd.f32 %v457_v26, %v1781_v60  ;;  %v459_v29 = vpop.f32.mrb[6].mxu0  ;;  %810 = vmatprep.mubr.bf16.mxu0 %v574_v21  ;;  %v575_v30 = vpack.c.bf16 %v554_v24, %v551_v19  ;;  %v1419_v33 = vpop.f32.mrb[4].mxu1 }
 0x104   : > { %v460_v31 = vadd.f32 %v459_v29, %v1779_v59  ;;  %v461_v32 = vpop.f32.mrb[7].mxu0  ;;  %811 = vmatmul.mubr.bf16.vlgmr.msra.gmra.mrb[16].mxu0 %v573_v18  ;;  %v543_v35 = vadd.f32 %v1419_v33, %v255_v62  ;;  %v534_v36 = vpop.f32.mrb[5].mxu1  ;;  %v555_v37 = vmax.f32 %v456_v25, 0.0 }
 0x105   : > { %v462_v34 = vadd.f32 %v461_v32, %v1781_v60  ;;  %1437 = vmatprep.mubr.bf16.mxu1 %v575_v30  ;;  %v535_v39 = vadd.f32 %v534_v36, %v255_v62  ;;  %v1420_v40 = vpop.f32.mrb[6].mxu1  ;;  %v556_v41 = vmax.f32 %v458_v28, 0.0 }
 0x106   : > { %v558_v38 = vmax.f32 %v460_v31, 0.0  ;;  %1438 = vmatmul.mubr.bf16.vlgmr.msra.gmra.mrb[8].mxu1 %v578_v27  ;;  %v569_v43 = vmax.f32 %v543_v35, 0.0  ;;  %v546_v44 = vadd.f32 %v1420_v40, %v255_v62  ;;  %v537_v45 = vpop.f32.mrb[7].mxu1 }
 0x107   : > { %v559_v42 = vmax.f32 %v462_v34, 0.0  ;;  %v563_v47 = vmax.f32 %v535_v39, 0.0  ;;  %v538_v48 = vadd.f32 %v537_v45, %v255_v62  ;;  %1446 = vmatpush3.bf16.msra.mxu1 %v1551_v20 }
 0x108   : > { %v576_v46 = vpack.c.bf16 %v558_v38, %v555_v37  ;;  %v572_v51 = vmax.f32 %v546_v44, 0.0 }
 0x109   : > { %v577_v49 = vpack.c.bf16 %v559_v42, %v556_v41  ;;  %v465_v50 = vpop.f32.mrb[8].mxu0  ;;  %v566_v54 = vmax.f32 %v538_v48, 0.0 }
 0x10a   : > { %v466_v52 = vadd.f32 %v465_v50, %v1779_v59  ;;  %v467_v53 = vpop.f32.mrb[9].mxu0  ;;  %v584_v57 = vpack.c.bf16 %v572_v51, %v569_v43 }
 0x10b   : > { %v468_v55 = vadd.f32 %v467_v53, %v1781_v60  ;;  %v469_v56 = vpop.f32.mrb[10].mxu0  ;;  %818 = vmatprep.mubr.bf16.mxu0 %v577_v49  ;;  %v581_v63 = vpack.c.bf16 %v566_v54, %v563_v47 }
 0x10c   : > { %v470_v58 = vadd.f32 %v469_v56, %v1779_v59  ;;  %v471_v61 = vpop.f32.mrb[11].mxu0  ;;  %819 = vmatmul.mubr.bf16.gmra.mrb[20].mxu0 %v576_v46  ;;  %v561_v62 = vmax.f32 %v466_v52, 0.0 }
 0x10d   : > { %v472_v0 = vadd.f32 %v471_v61, %v1781_v60  ;;  %1441 = vmatprep.mubr.bf16.mxu1 %v581_v63  ;;  %v562_v2 = vmax.f32 %v468_v55, 0.0 }
 0x10e   : > { %v564_v1 = vmax.f32 %v470_v58, 0.0  ;;  %1442 = vmatmul.mubr.bf16.gmra.mrb[12].mxu1 %v584_v57 }
 0x10f   : > { %v565_v3 = vmax.f32 %v472_v0, 0.0 }
 0x110   : > { %v579_v4 = vpack.c.bf16 %v564_v1, %v561_v62  ;;  %v1553_v62 = vld [vmem:[%s1876_s2 + $0xd0] sm:$0xff]   ;;  %v1554_v1 = vld [vmem:[%s1876_s2 + $0xd8] sm:$0xff]  }
 0x111   : > { %v580_v5 = vpack.c.bf16 %v565_v3, %v562_v2  ;;  %v475_v6 = vpop.f32.mrb[12].mxu0  ;;  %1457 = vmatprep.subr.bf16.mxu0 %v1553_v62 }
 0x112   : > { %v476_v7 = vadd.f32 %v475_v6, %v1779_v59  ;;  %v477_v8 = vpop.f32.mrb[13].mxu0  ;;  %1458 = vmatpush3.bf16.msra.mxu0 %v1553_v62 }
 0x113   : > { %v478_v9 = vadd.f32 %v477_v8, %v1781_v60  ;;  %v479_v10 = vpop.f32.mrb[14].mxu0  ;;  %826 = vmatprep.mubr.bf16.mxu0 %v580_v5  ;;  %1459 = vmatprep.subr.bf16.mxu0 %v1554_v1 }
 0x114   : > { %v480_v11 = vadd.f32 %v479_v10, %v1779_v59  ;;  %v481_v12 = vpop.f32.mrb[15].mxu0  ;;  %827 = vmatmul.mubr.bf16.gmra.mrb[24].mxu0 %v579_v4  ;;  %v567_v14 = vmax.f32 %v476_v7, 0.0  ;;  %v1552_v59 = vld [vmem:[%s1876_s2 + $0xc8] sm:$0xff]  }
 0x115   : > { %v482_v13 = vadd.f32 %v481_v12, %v1781_v60  ;;  %v568_v16 = vmax.f32 %v478_v9, 0.0  ;;  %1447 = vmatprep.subr.bf16.mxu1 %v1552_v59 }
 0x116   : > { %v570_v15 = vmax.f32 %v480_v11, 0.0  ;;  %1448 = vmatpush3.bf16.msra.mxu1 %v1552_v59  ;;  %1460 = vmatpush3.bf16.msra.mxu0 %v1554_v1  ;;  %v1555_v59 = vld [vmem:[%s1876_s2 + $0xe0] sm:$0xff]  }
 0x117   : > { %v571_v17 = vmax.f32 %v482_v13, 0.0  ;;  %1473 = vmatprep.subr.bf16.mxu1 %v1553_v62  ;;  %1461 = vmatprep.subr.bf16.mxu0 %v1555_v59 }
 0x118   : > { %v582_v18 = vpack.c.bf16 %v570_v15, %v567_v14 }
 0x119   : > { %v583_v19 = vpack.c.bf16 %v571_v17, %v568_v16 }
 0x11a   : > { %1462 = vmatpush3.bf16.msra.mxu0 %v1555_v59 }
 0x11b   : > { %834 = vmatprep.mubr.bf16.mxu0 %v583_v19 }
 0x11c   : > { %835 = vmatmul.mubr.bf16.gmra.mrb[28].mxu0 %v582_v18 }
 0x1d7   : > { %v1347_v60 = vpop.f32.mrb[16].mxu0 }
 0x1d8   : > { %v1348_v21 = vpop.f32.mrb[17].mxu0 }
 0x1d9   : > { %v1349_v23 = vadd.f32 %v1348_v21, %v1347_v60  ;;  %v1350_v24 = vpop.f32.mrb[18].mxu0  ;;  %v1439_v26 = vpop.f32.mrb[8].mxu1  ;;  %v1556_v60 = vld [vmem:[%s1876_s2 + $0xe8] sm:$0xff]   ;;  %v924_v21 = vld [vmem:[%s1877_s3 + $0x2] ss:$0 sm:$0xff] }
 0x1da   : > { %v1351_v25 = vpop.f32.mrb[19].mxu0  ;;  %v877_v29 = vpop.f32.mrb[9].mxu1  ;;  %1463 = vmatprep.subr.bf16.mxu0 %v1556_v60 }
 0x1db   : > { %v1352_v27 = vadd.f32 %v1351_v25, %v1350_v24  ;;  %v813_v28 = vadd.f32 %v1349_v23, %v1808_v22  ;;  %v1440_v30 = vpop.f32.mrb[10].mxu1  ;;  %1464 = vmatpush3.bf16.msra.mxu0 %v1556_v60 }
 0x1dc   : > { %v880_v33 = vpop.f32.mrb[11].mxu1 }
 0x1dd   : > { %v878_v31 = vadd.f32 %v877_v29, %v813_v28  ;;  %v816_v32 = vadd.f32 %v1352_v27, %v1808_v22 }
 0x1df   : > { %v881_v34 = vadd.f32 %v880_v33, %v816_v32  ;;  %v1353_v35 = vpop.f32.mrb[20].mxu0  ;;  %1067 = vrot.lane.b32.xlu0 %v878_v31, %s1582_s5  ;;  %v908_v37 = vmax.f32 %v878_v31, 0.0 }
 0x1e0   : > { %v1354_v36 = vpop.f32.mrb[21].mxu0 }
 0x1e1   : > { %v909_v38 = vmax.f32 %v881_v34, 0.0  ;;  %v1355_v39 = vadd.f32 %v1354_v36, %v1353_v35  ;;  %v1356_v40 = vpop.f32.mrb[22].mxu0  ;;  %v1443_v42 = vpop.f32.mrb[12].mxu1 }
 0x1e2   : > { %v1357_v41 = vpop.f32.mrb[23].mxu0  ;;  %v893_v46 = vpop.f32.mrb[13].mxu1 }
 0x1e3   : > { %v916_v43 = vpack.c.bf16 %v909_v38, %v908_v37  ;;  %v821_v44 = vadd.f32 %v1355_v39, %v1808_v22  ;;  %v1358_v45 = vadd.f32 %v1357_v41, %v1356_v40  ;;  %1069 = vrot.lane.b32.xlu0 %v881_v34, %s1582_s5  ;;  %v1444_v47 = vpop.f32.mrb[14].mxu1 }
 0x1e4   : > { %v896_v50 = vpop.f32.mrb[15].mxu1 }
 0x1e5   : > { %v824_v48 = vadd.f32 %v1358_v45, %v1808_v22  ;;  %1449 = vmatprep.mubr.msk.bf16.mxu1 %vm937_vm0, %v916_v43  ;;  %v886_v49 = vadd.f32 %v1439_v26, %v821_v44 }
 0x1e7   : > { %v1359_v51 = vpop.f32.mrb[24].mxu0  ;;  %1071 = vrot.lane.b32.xlu1 %v886_v49, %s1582_s5  ;;  %v889_v52 = vadd.f32 %v1440_v30, %v824_v48  ;;  %v910_v54 = vmax.f32 %v886_v49, 0.0 }
 0x1e8   : > { %v1360_v53 = vpop.f32.mrb[25].mxu0 }
 0x1e9   : > { %v1361_v55 = vadd.f32 %v1360_v53, %v1359_v51  ;;  %v1362_v56 = vpop.f32.mrb[26].mxu0  ;;  %v911_v57 = vmax.f32 %v889_v52, 0.0 }
 0x1ea   : > { %v1363_v58 = vpop.f32.mrb[27].mxu0 }
 0x1eb   : > { %v1364_v61 = vadd.f32 %v1363_v58, %v1362_v56  ;;  %1073 = vrot.lane.b32.xlu1 %v889_v52, %s1582_s5  ;;  %v917_v63 = vpack.c.bf16 %v911_v57, %v910_v54  ;;  %v829_v0 = vadd.f32 %v1361_v55, %v1808_v22 }
 0x1ed   : > { %v894_v2 = vadd.f32 %v893_v46, %v829_v0  ;;  %1450 = vmatmul.mubr.msk.bf16.vlgmr.msra.gmra.mrb[16].mxu1 %vm937_vm0, %v917_v63  ;;  %v832_v3 = vadd.f32 %v1364_v61, %v1808_v22 }
 0x1ee   : > { %1477 = vmatpush3.bf16.msra.mxu1 %v1553_v62 }
 0x1ef   : > { %v897_v4 = vadd.f32 %v896_v50, %v832_v3  ;;  %v1365_v5 = vpop.f32.mrb[28].mxu0  ;;  %1075 = vrot.lane.b32.xlu0 %v894_v2, %s1582_s5  ;;  %v912_v7 = vmax.f32 %v894_v2, 0.0  ;;  %1474 = vmatprep.subr.bf16.mxu1 %v1554_v1 }
 0x1f0   : > { %v1366_v6 = vpop.f32.mrb[29].mxu0 }
 0x1f1   : > { %v913_v8 = vmax.f32 %v897_v4, 0.0  ;;  %v1367_v9 = vadd.f32 %v1366_v6, %v1365_v5  ;;  %v1368_v10 = vpop.f32.mrb[30].mxu0  ;;  %1077 = vrot.lane.b32.xlu1 %v897_v4, %s1582_s5 }
 0x1f2   : > { %v1369_v11 = vpop.f32.mrb[31].mxu0  ;;  %1478 = vmatpush3.bf16.msra.mxu1 %v1554_v1 }
 0x1f3   : > { %v918_v12 = vpack.c.bf16 %v913_v8, %v912_v7  ;;  %v837_v13 = vadd.f32 %v1367_v9, %v1808_v22  ;;  %v1370_v14 = vadd.f32 %v1369_v11, %v1368_v10  ;;  %1475 = vmatprep.subr.bf16.mxu1 %v1555_v59 }
 0x1f5   : > { %v840_v15 = vadd.f32 %v1370_v14, %v1808_v22  ;;  %1453 = vmatprep.mubr.msk.bf16.mxu1 %vm937_vm0, %v918_v12  ;;  %v902_v16 = vadd.f32 %v1443_v42, %v837_v13 }
 0x1f6   : > { %1479 = vmatpush3.bf16.msra.mxu1 %v1555_v59 }
 0x1f7   : > { %1079 = vrot.lane.b32.xlu0 %v902_v16, %s1582_s5  ;;  %v905_v17 = vadd.f32 %v1444_v47, %v840_v15  ;;  %v914_v18 = vmax.f32 %v902_v16, 0.0  ;;  %1476 = vmatprep.subr.bf16.mxu1 %v1556_v60 }
 0x1f9   : > { %v915_v19 = vmax.f32 %v905_v17, 0.0  ;;  %1081 = vrot.lane.b32.xlu1 %v905_v17, %s1582_s5 }
 0x1fa   : > { %1480 = vmatpush3.bf16.msra.mxu1 %v1556_v60 }
 0x1fb   : > { %v919_v20 = vpack.c.bf16 %v915_v19, %v914_v18 }
 0x1fd   : > { %1454 = vmatmul.mubr.msk.bf16.gmra.mrb[20].mxu1 %vm937_vm0, %v919_v20 }
 0x251   : > { %v1068_v51 = vpop.permute.xlu0 %1067 }
 0x255   : > { %v1070_v58 = vpop.permute.xlu0 %1069 }
 0x259   : > { %v1072_v50 = vpop.permute.xlu1 %1071 }
 0x25d   : > { %v1074_v55 = vpop.permute.xlu1 %1073 }
 0x261   : > { %v1076_v62 = vpop.permute.xlu0 %1075 }
 0x263   : > { %v1078_v3 = vpop.permute.xlu1 %1077 }
 0x269   : > { %v1080_v6 = vpop.permute.xlu0 %1079 }
 0x26b   : > { %v1082_v10 = vpop.permute.xlu1 %1081 }
 0x2c0   : > { %v1451_v22 = vpop.f32.mrb[16].mxu1 }
 0x2c1   : > { %v993_v23 = vadd.f32 %v1451_v22, %v924_v21  ;;  %v984_v24 = vpop.f32.mrb[17].mxu1 }
 0x2c2   : > { %v985_v25 = vadd.f32 %v984_v24, %v924_v21  ;;  %v1452_v26 = vpop.f32.mrb[18].mxu1 }
 0x2c3   : > { %v996_v27 = vadd.f32 %v1452_v26, %v924_v21  ;;  %v987_v28 = vpop.f32.mrb[19].mxu1  ;;  %v1017_v30 = vmax.f32 %v993_v23, 0.0 }
 0x2c4   : > { %v988_v29 = vadd.f32 %v987_v28, %v924_v21  ;;  %v1015_v32 = vmax.f32 %v985_v25, 0.0 }
 0x2c5   : > { %v1018_v31 = vmax.f32 %v996_v27, 0.0 }
 0x2c6   : > { %v1016_v33 = vmax.f32 %v988_v29, 0.0 }
 0x2c7   : > { %v1024_v34 = vpack.c.bf16 %v1018_v31, %v1017_v30 }
 0x2c8   : > { %v1023_v35 = vpack.c.bf16 %v1016_v33, %v1015_v32 }
 0x2ca   : > { %1465 = vmatprep.mubr.msk.bf16.mxu0 %vm1091_vm1, %v1023_v35 }
 0x2cb   : > { %1466 = vmatmul.mubr.msk.bf16.vlgmr.msra.gmra.mrb[32].mxu0 %vm1091_vm1, %v1024_v34 }
 0x2d0   : > { %v1455_v36 = vpop.f32.mrb[20].mxu1 }
 0x2d1   : > { %v1009_v37 = vadd.f32 %v1455_v36, %v924_v21  ;;  %v1000_v38 = vpop.f32.mrb[21].mxu1 }
 0x2d2   : > { %v1001_v39 = vadd.f32 %v1000_v38, %v924_v21  ;;  %v1456_v40 = vpop.f32.mrb[22].mxu1 }
 0x2d3   : > { %v1012_v41 = vadd.f32 %v1456_v40, %v924_v21  ;;  %v1003_v42 = vpop.f32.mrb[23].mxu1  ;;  %v1021_v44 = vmax.f32 %v1009_v37, 0.0 }
 0x2d4   : > { %v1004_v43 = vadd.f32 %v1003_v42, %v924_v21  ;;  %v1019_v46 = vmax.f32 %v1001_v39, 0.0 }
 0x2d5   : > { %v1022_v45 = vmax.f32 %v1012_v41, 0.0 }
 0x2d6   : > { %v1020_v47 = vmax.f32 %v1004_v43, 0.0 }
 0x2d7   : > { %v1026_v48 = vpack.c.bf16 %v1022_v45, %v1021_v44 }
 0x2d8   : > { %v1025_v49 = vpack.c.bf16 %v1020_v47, %v1019_v46 }
 0x2da   : > { %1469 = vmatprep.mubr.msk.bf16.mxu1 %vm1091_vm1, %v1025_v49 }
 0x2db   : > { %1470 = vmatmul.mubr.msk.bf16.vlgmr.msra.gmra.mrb[24].mxu1 %vm1091_vm1, %v1026_v48 }
 0x39e   : > { %v1467_v52 = vpop.f32.mrb[32].mxu0 }
 0x39f   : > { %v1147_v53 = vadd.f32 %v1467_v52, %v1072_v50  ;;  %v1138_v54 = vpop.f32.mrb[33].mxu0 }
 0x3a0   : > { %v1139_v56 = vadd.f32 %v1138_v54, %v1068_v51  ;;  %v1468_v57 = vpop.f32.mrb[34].mxu0 }
 0x3a1   : > { %1557 = vtanh.f32 %v1147_v53  ;;  %v1150_v61 = vadd.f32 %v1468_v57, %v1074_v55  ;;  %v1141_v63 = vpop.f32.mrb[35].mxu0 }
 0x3a2   : > { %1559 = vtanh.f32 %v1139_v56  ;;  %v1142_v0 = vadd.f32 %v1141_v63, %v1070_v58 }
 0x3a3   : > { %1561 = vtanh.f32 %v1150_v61 }
 0x3a4   : > { %1563 = vtanh.f32 %v1142_v0 }
 0x3ab   : > { %v1558_v1 = vpop.eup %1557 }
 0x3ac   : > { %v1560_v2 = vpop.eup %1559  ;;  %1180 = vst.msk [vmem:[%s1853_s20 + $0x10] sm:$0xff] %vm1177_vm2, %v1558_v1 }
 0x3ad   : > { %v1562_v4 = vpop.eup %1561  ;;  %1178 = vst.msk [vmem:[%s1853_s20] sm:$0xff] %vm1177_vm2, %v1560_v2 }
 0x3ae   : > { %v1564_v5 = vpop.eup %1563  ;;  %1181 = vst.msk [vmem:[%s1853_s20 + $0x18] sm:$0xff] %vm1177_vm2, %v1562_v4  ;;  %v1471_v7 = vpop.f32.mrb[24].mxu1 }
 0x3af   : > { %1179 = vst.msk [vmem:[%s1853_s20 + $0x8] sm:$0xff] %vm1177_vm2, %v1564_v5  ;;  %v1163_v8 = vadd.f32 %v1471_v7, %v1080_v6  ;;  %v1154_v9 = vpop.f32.mrb[25].mxu1 }
 0x3b0   : > { %v1155_v11 = vadd.f32 %v1154_v9, %v1076_v62  ;;  %v1472_v12 = vpop.f32.mrb[26].mxu1 }
 0x3b1   : > { %1565 = vtanh.f32 %v1163_v8  ;;  %v1166_v13 = vadd.f32 %v1472_v12, %v1082_v10  ;;  %v1157_v14 = vpop.f32.mrb[27].mxu1 }
 0x3b2   : > { %1567 = vtanh.f32 %v1155_v11  ;;  %v1158_v15 = vadd.f32 %v1157_v14, %v1078_v3 }
 0x3b3   : > { %1569 = vtanh.f32 %v1166_v13 }
 0x3b4   : > { %1571 = vtanh.f32 %v1158_v15 }
 0x3bb   : > { %v1566_v16 = vpop.eup %1565 }
 0x3bc   : > { %v1568_v17 = vpop.eup %1567  ;;  %1184 = vst.msk [vmem:[%s1853_s20 + $0x30] sm:$0xff] %vm1177_vm2, %v1566_v16 }
 0x3bd   : > { %v1570_v18 = vpop.eup %1569  ;;  %1182 = vst.msk [vmem:[%s1853_s20 + $0x20] sm:$0xff] %vm1177_vm2, %v1568_v17 }
 0x3be   : > { %v1572_v19 = vpop.eup %1571  ;;  %1185 = vst.msk [vmem:[%s1853_s20 + $0x38] sm:$0xff] %vm1177_vm2, %v1570_v18 }
 0x3bf   : > { %1183 = vst.msk [vmem:[%s1853_s20 + $0x28] sm:$0xff] %vm1177_vm2, %v1572_v19 }
 0x3c0 PF: > { %s14_s15 = sadd.s32 1, %s1579_s15  }
 0x3c1   : > { %p11_p4 = scmp.ge.s32.totalorder %s14_s15, 4  }
 0x3c3   :  { %13 = sbr.rel (!%p11_p4) target bundleno = 1 (0x1), region = 66 }

</bundles_post_ra>
